<compile_context>
chip_gen: v7x
topology: tpu7x:2x2x1
jax: 0.10.0
libtpu: 0.0.40
codegen_flags: <defaults>
</compile_context>

<pallas_src>
import jax
import jax.numpy as jnp
from jax.experimental import pallas as pl
from jax.experimental.pallas import tpu as pltpu


# ----------------------------------------------------------------------------
# Interpolation-matrix construction (host/XLA side, tiny)
# ----------------------------------------------------------------------------
def bilinear_matrix(out_size: int, in_size: int, dtype=jnp.float32):
    """1-D interpolation matrix W (out_size, in_size) matching
    torch.nn.functional.interpolate(mode='bilinear', align_corners=False)."""
    i = jnp.arange(out_size, dtype=jnp.float32)
    src = (i + 0.5) * (in_size / out_size) - 0.5
    src = jnp.maximum(src, 0.0)                      # PyTorch clamps negative src to 0
    i0 = jnp.floor(src).astype(jnp.int32)
    i0 = jnp.minimum(i0, in_size - 1)
    frac = src - i0.astype(jnp.float32)
    i1 = jnp.minimum(i0 + 1, in_size - 1)            # edge clamp
    oh0 = jax.nn.one_hot(i0, in_size, dtype=jnp.float32)
    oh1 = jax.nn.one_hot(i1, in_size, dtype=jnp.float32)
    w = (1.0 - frac)[:, None] * oh0 + frac[:, None] * oh1
    return w.astype(dtype)


def _fused_resize_matrix(h_out, w_out, h_in, w_in, dtype):
    """(h_in*w_in, h_out*w_out) matrix M such that x_flat @ M == bilinear resize."""
    wh = bilinear_matrix(h_out, h_in)                 # (h_out, h_in)
    ww = bilinear_matrix(w_out, w_in)                 # (w_out, w_in)
    m = jnp.einsum('oh,pw->hwop', wh, ww)             # (h_in, w_in, h_out, w_out)
    return m.reshape(h_in * w_in, h_out * w_out).astype(dtype)


# ----------------------------------------------------------------------------
# Generation-aware sizing helpers
# ----------------------------------------------------------------------------
def _tpu_budgets():
    """Returns (vmem_limit_bytes, per-block budget, row cap, num tensorcores)."""
    vmem_cap = 64 * 1024 * 1024        # conservative fallback: assume v7x-class
    num_cores = 2
    try:
        info = pltpu.get_tpu_info()
        vmem_cap = int(getattr(info, "vmem_capacity_bytes", vmem_cap))
        for attr in ("num_cores", "tensorcores_per_chip", "num_tensorcores", "core_count"):
            v = getattr(info, attr, None)
            if isinstance(v, int) and v > 0:
                num_cores = v
                break
    except Exception:
        pass
    if vmem_cap <= 64 * 1024 * 1024:
        # v7x-class: 64 MiB physical VMEM, 2 TensorCores / chip.
        return 48 * 1024 * 1024, 24 * 1024 * 1024, 1024, max(num_cores, 2)
    # v5e / v6e class: 128 MiB physical VMEM.
    return 96 * 1024 * 1024, 48 * 1024 * 1024, 2048, num_cores


def _sublane_multiple(dtype):
    size = jnp.dtype(dtype).itemsize
    if size >= 4:
        return 8
    if size == 2:
        return 16
    return 32


def _choose_rows_per_block(n_rows, bytes_per_row, resident_bytes, *,
                           block_budget, row_cap, sublane_mult, min_steps):
    """Largest channel-block size that (a) divides n_rows, (b) satisfies the
    dtype-aware sublane constraint (multiple of sublane_mult or == n_rows),
    (c) fits the VMEM budget with double-buffered activations, preferring at
    least `min_steps` grid steps (>= 2 per TensorCore).  Bounded downward scan."""
    budget = max(0, block_budget - resident_bytes)
    cap = max(1, budget // max(1, 2 * bytes_per_row))     # x2: double-buffered pipeline
    cap = int(min(cap, row_cap, n_rows))

    def ok(d):
        return n_rows % d == 0 and (d % sublane_mult == 0 or d == n_rows)

    best = None
    for d in range(cap, 0, -1):                            # bounded by row_cap
        if not ok(d):
            continue
        if best is None:
            best = d                                       # largest feasible block
        if n_rows // d >= min_steps:
            return d                                       # largest block with >= min_steps
    return best if best is not None else n_rows


# ----------------------------------------------------------------------------
# Kernel
# ----------------------------------------------------------------------------
def _intra_view_aa_kernel(x0_ref, x1_ref, x2_ref, m1_ref, m2_ref, o_ref):
    # x0_ref: (TC, H0*W0)   x1_ref: (TC, H1*W1)   x2_ref: (TC, H2*W2)
    # m1_ref: (H1*W1, H0*W0) m2_ref: (H2*W2, H0*W0) — VMEM-resident constants.
    up1 = jnp.dot(x1_ref[...], m1_ref[...], preferred_element_type=jnp.float32)
    up2 = jnp.dot(x2_ref[...], m2_ref[...], preferred_element_type=jnp.float32)
    o_ref[...] = (x0_ref[...].astype(jnp.float32) + up1 + up2).astype(o_ref.dtype)


# ----------------------------------------------------------------------------
# Wrapper
# ----------------------------------------------------------------------------
def intra_view_aa(x0, x1, x2):
    """x0: (B, C, H0, W0), x1: (B, C, H1, W1), x2: (B, C, H2, W2) -> (B, C, H0, W0)."""
    B, C, H0, W0 = x0.shape
    _, _, H1, W1 = x1.shape
    _, _, H2, W2 = x2.shape
    assert x0.dtype == x1.dtype == x2.dtype, "expected consistent input dtypes"
    N = B * C
    S0, S1, S2 = H0 * W0, H1 * W1, H2 * W2

    vmem_limit, block_budget, row_cap, num_cores = _tpu_budgets()

    # Weight dtype: bf16 inputs -> bf16 weights (native MXU path, f32 accumulation).
    # Guard: if the fused weights would eat most of the block budget, force bf16.
    w_dtype = jnp.bfloat16 if x0.dtype == jnp.bfloat16 else jnp.float32
    weight_elems = (S1 + S2) * S0
    if w_dtype == jnp.float32 and weight_elems * 4 > block_budget // 2:
        w_dtype = jnp.bfloat16
    m1 = _fused_resize_matrix(H0, W0, H1, W1, w_dtype)      # (S1, S0)
    m2 = _fused_resize_matrix(H0, W0, H2, W2, w_dtype)      # (S2, S0)

    # Lane-dense flattened views (wrapper-side layout plumbing, no compute).
    x0f = x0.reshape(N, S0)
    x1f = x1.reshape(N, S1)
    x2f = x2.reshape(N, S2)

    itemsize = jnp.dtype(x0.dtype).itemsize
    w_itemsize = jnp.dtype(w_dtype).itemsize
    bytes_per_row = (2 * S0 + S1 + S2) * itemsize            # x0 + x1 + x2 + out rows
    sublane_mult = _sublane_multiple(x0.dtype)
    min_steps = 2 * num_cores                                # >= 2 steps per TensorCore

    # Advisory cost estimate: 2 matmuls + adds; HBM traffic of all operands + weights.
    cost = pl.CostEstimate(
        flops=2 * N * (S1 + S2) * S0 + 2 * N * S0,
        transcendentals=0,
        bytes_accessed=N * bytes_per_row + weight_elems * w_itemsize,
    )

    def run(single_buffer_weights):
        weight_buffers = 1 if single_buffer_weights else 2
        resident_bytes = weight_buffers * weight_elems * w_itemsize
        tc = _choose_rows_per_block(
            N, bytes_per_row, resident_bytes,
            block_budget=block_budget, row_cap=row_cap,
            sublane_mult=sublane_mult, min_steps=min_steps)
        w_kwargs = {"pipeline_mode": pl.Buffered(1)} if single_buffer_weights else {}
        return pl.pallas_call(
            _intra_view_aa_kernel,
            out_shape=jax.ShapeDtypeStruct((N, S0), x0.dtype),
            grid=(N // tc,),
            in_specs=[
                pl.BlockSpec((tc, S0), lambda i: (i, 0)),
                pl.BlockSpec((tc, S1), lambda i: (i, 0)),
                pl.BlockSpec((tc, S2), lambda i: (i, 0)),
                # Constant index_maps -> DMA'd once, stay VMEM-resident; single-buffered.
                pl.BlockSpec((S1, S0), lambda i: (0, 0), **w_kwargs),
                pl.BlockSpec((S2, S0), lambda i: (0, 0), **w_kwargs),
            ],
            out_specs=pl.BlockSpec((tc, S0), lambda i: (i, 0)),
            compiler_params=pltpu.CompilerParams(
                dimension_semantics=("parallel",),
                vmem_limit_bytes=vmem_limit,
            ),
            cost_estimate=cost,
        )(x0f, x1f, x2f, m1, m2)

    try:
        out = run(True)
    except Exception:
        # pipeline_mode=pl.Buffered(1) not supported on this jax version:
        # fall back to default double-buffered weights (budget re-derived for 2 buffers).
        out = run(False)

    return out.reshape(B, C, H0, W0)


# ----------------------------------------------------------------------------
# Pure-JAX reference (upsampling only: jax bilinear == torch align_corners=False)
# ----------------------------------------------------------------------------
def intra_view_aa_ref(x0, x1, x2):
    B, C, H0, W0 = x0.shape
    up1 = jax.image.resize(x1, (B, C, H0, W0), method='bilinear')
    up2 = jax.image.resize(x2, (B, C, H0, W0), method='bilinear')
    return x0 + up1.astype(x0.dtype) + up2.astype(x0.dtype)


if __name__ == "__main__":
    # Module has no learnable parameters (only nn.Identity), nothing to init.
    key = jax.random.PRNGKey(0)
    k0, k1, k2 = jax.random.split(key, 3)

    B, C = 2, 4
    x0 = jax.random.normal(k0, (B, C, 16, 16), dtype=jnp.float32)
    x1 = jax.random.normal(k1, (B, C, 8, 8), dtype=jnp.float32)
    x2 = jax.random.normal(k2, (B, C, 4, 4), dtype=jnp.float32)

    out = intra_view_aa(x0, x1, x2)
    jax.block_until_ready(out)

    ref = intra_view_aa_ref(x0, x1, x2)
    assert out.shape == (B, C, 16, 16)
    assert jnp.allclose(out, ref, atol=1e-4, rtol=1e-4), float(jnp.max(jnp.abs(out - ref)))

    print("KERNEL_OK")
</pallas_src>

<mosaic_0001>
module attributes {stable_mosaic.version = 11 : i64} {
  func.func @_intra_view_aa_kernel(%arg0: i32, %arg1: memref<8x256xf32, #tpu.memory_space<vmem>>, %arg2: memref<8x64xf32, #tpu.memory_space<vmem>>, %arg3: memref<8x16xf32, #tpu.memory_space<vmem>>, %arg4: memref<64x256xf32, #tpu.memory_space<vmem>>, %arg5: memref<16x256xf32, #tpu.memory_space<vmem>>, %arg6: memref<8x256xf32, #tpu.memory_space<vmem>>) attributes {dimension_semantics = [#tpu.dimension_semantics<parallel>], iteration_bounds = array<i64: 1>, scalar_prefetch = 0 : i64, scratch_operands = 0 : i64, tpu.core_type = #tpu.core_type<tc>, window_params = [{transform_indices = @transform_0, window_bounds = array<i64: 8, 256>}, {transform_indices = @transform_1, window_bounds = array<i64: 8, 64>}, {transform_indices = @transform_2, window_bounds = array<i64: 8, 16>}, {pipeline_mode = #tpu.pipeline_mode<synchronous>, transform_indices = @transform_3, window_bounds = array<i64: 64, 256>}, {pipeline_mode = #tpu.pipeline_mode<synchronous>, transform_indices = @transform_4, window_bounds = array<i64: 16, 256>}, {transform_indices = @transform_5, window_bounds = array<i64: 8, 256>}]} {
    %c0 = arith.constant 0 : index
    %c0_0 = arith.constant 0 : index
    %0 = vector.load %arg2[%c0, %c0_0] : memref<8x64xf32, #tpu.memory_space<vmem>>, vector<8x64xf32>
    %c0_1 = arith.constant 0 : index
    %c0_2 = arith.constant 0 : index
    %1 = vector.load %arg4[%c0_1, %c0_2] : memref<64x256xf32, #tpu.memory_space<vmem>>, vector<64x256xf32>
    %cst = arith.constant dense<0.000000e+00> : vector<8x256xf32>
    %2 = tpu.matmul %0, %1, %cst {dimension_numbers = #tpu.dot_dimension_numbers<[1], [0], [0], [1], [0, 0, 1, 1], [], []>} : vector<8x64xf32>, vector<64x256xf32>, vector<8x256xf32> -> vector<8x256xf32>
    %c0_3 = arith.constant 0 : index
    %c0_4 = arith.constant 0 : index
    %3 = vector.load %arg3[%c0_3, %c0_4] : memref<8x16xf32, #tpu.memory_space<vmem>>, vector<8x16xf32>
    %c0_5 = arith.constant 0 : index
    %c0_6 = arith.constant 0 : index
    %4 = vector.load %arg5[%c0_5, %c0_6] : memref<16x256xf32, #tpu.memory_space<vmem>>, vector<16x256xf32>
    %cst_7 = arith.constant dense<0.000000e+00> : vector<8x256xf32>
    %5 = tpu.matmul %3, %4, %cst_7 {dimension_numbers = #tpu.dot_dimension_numbers<[1], [0], [0], [1], [0, 0, 1, 1], [], []>} : vector<8x16xf32>, vector<16x256xf32>, vector<8x256xf32> -> vector<8x256xf32>
    %c0_8 = arith.constant 0 : index
    %c0_9 = arith.constant 0 : index
    %6 = vector.load %arg1[%c0_8, %c0_9] : memref<8x256xf32, #tpu.memory_space<vmem>>, vector<8x256xf32>
    %7 = arith.addf %6, %2 : vector<8x256xf32>
    %8 = arith.addf %7, %5 : vector<8x256xf32>
    %c0_10 = arith.constant 0 : index
    %c0_11 = arith.constant 0 : index
    %9 = vector.load %arg6[%c0_10, %c0_11] : memref<8x256xf32, #tpu.memory_space<vmem>>, vector<8x256xf32>
    tpu.vector_store %arg6[%c0_10, %c0_11], %8 {strides = array<i32>} : memref<8x256xf32, #tpu.memory_space<vmem>>, vector<8x256xf32>,
    return
  }
  func.func @transform_0(%arg0: i32) -> (i32, i32) {
    %c0_i32 = arith.constant 0 : i32
    %c0_i32_0 = arith.constant 0 : i32
    return %arg0, %c0_i32 : i32, i32
  }
  func.func @transform_1(%arg0: i32) -> (i32, i32) {
    %c0_i32 = arith.constant 0 : i32
    %c0_i32_0 = arith.constant 0 : i32
    return %arg0, %c0_i32 : i32, i32
  }
  func.func @transform_2(%arg0: i32) -> (i32, i32) {
    %c0_i32 = arith.constant 0 : i32
    %c0_i32_0 = arith.constant 0 : i32
    return %arg0, %c0_i32 : i32, i32
  }
  func.func @transform_3(%arg0: i32) -> (i32, i32) {
    %c0_i32 = arith.constant 0 : i32
    %c0_i32_0 = arith.constant 0 : i32
    %c0_i32_1 = arith.constant 0 : i32
    return %c0_i32, %c0_i32_0 : i32, i32
  }
  func.func @transform_4(%arg0: i32) -> (i32, i32) {
    %c0_i32 = arith.constant 0 : i32
    %c0_i32_0 = arith.constant 0 : i32
    %c0_i32_1 = arith.constant 0 : i32
    return %c0_i32, %c0_i32_0 : i32, i32
  }
  func.func @transform_5(%arg0: i32) -> (i32, i32) {
    %c0_i32 = arith.constant 0 : i32
    %c0_i32_0 = arith.constant 0 : i32
    return %arg0, %c0_i32 : i32, i32
  }
}

module attributes {stable_mosaic.version = 11 : i64} {
  func.func @_intra_view_aa_kernel(%arg0: i32, %arg1: memref<8x256xf32, #tpu.memory_space<vmem>>, %arg2: memref<8x64xf32, #tpu.memory_space<vmem>>, %arg3: memref<8x16xf32, #tpu.memory_space<vmem>>, %arg4: memref<64x256xf32, #tpu.memory_space<vmem>>, %arg5: memref<16x256xf32, #tpu.memory_space<vmem>>, %arg6: memref<8x256xf32, #tpu.memory_space<vmem>>) attributes {dimension_semantics = [#tpu.dimension_semantics<parallel>], iteration_bounds = array<i64: 1>, scalar_prefetch = 0 : i64, scratch_operands = 0 : i64, tpu.core_type = #tpu.core_type<tc>, window_params = [{transform_indices = @transform_0, window_bounds = array<i64: 8, 256>}, {transform_indices = @transform_1, window_bounds = array<i64: 8, 64>}, {transform_indices = @transform_2, window_bounds = array<i64: 8, 16>}, {pipeline_mode = #tpu.pipeline_mode<synchronous>, transform_indices = @transform_3, window_bounds = array<i64: 64, 256>}, {pipeline_mode = #tpu.pipeline_mode<synchronous>, transform_indices = @transform_4, window_bounds = array<i64: 16, 256>}, {transform_indices = @transform_5, window_bounds = array<i64: 8, 256>}]} {
    %c0 = arith.constant 0 : index
    %c0_0 = arith.constant 0 : index
    %0 = vector.load %arg2[%c0, %c0_0] : memref<8x64xf32, #tpu.memory_space<vmem>>, vector<8x64xf32>
    %c0_1 = arith.constant 0 : index
    %c0_2 = arith.constant 0 : index
    %1 = vector.load %arg4[%c0_1, %c0_2] : memref<64x256xf32, #tpu.memory_space<vmem>>, vector<64x256xf32>
    %cst = arith.constant dense<0.000000e+00> : vector<8x256xf32>
    %2 = tpu.matmul %0, %1, %cst {dimension_numbers = #tpu.dot_dimension_numbers<[1], [0], [0], [1], [0, 0, 1, 1], [], []>} : vector<8x64xf32>, vector<64x256xf32>, vector<8x256xf32> -> vector<8x256xf32>
    %c0_3 = arith.constant 0 : index
    %c0_4 = arith.constant 0 : index
    %3 = vector.load %arg3[%c0_3, %c0_4] : memref<8x16xf32, #tpu.memory_space<vmem>>, vector<8x16xf32>
    %c0_5 = arith.constant 0 : index
    %c0_6 = arith.constant 0 : index
    %4 = vector.load %arg5[%c0_5, %c0_6] : memref<16x256xf32, #tpu.memory_space<vmem>>, vector<16x256xf32>
    %cst_7 = arith.constant dense<0.000000e+00> : vector<8x256xf32>
    %5 = tpu.matmul %3, %4, %cst_7 {dimension_numbers = #tpu.dot_dimension_numbers<[1], [0], [0], [1], [0, 0, 1, 1], [], []>} : vector<8x16xf32>, vector<16x256xf32>, vector<8x256xf32> -> vector<8x256xf32>
    %c0_8 = arith.constant 0 : index
    %c0_9 = arith.constant 0 : index
    %6 = vector.load %arg1[%c0_8, %c0_9] : memref<8x256xf32, #tpu.memory_space<vmem>>, vector<8x256xf32>
    %7 = arith.addf %6, %2 : vector<8x256xf32>
    %8 = arith.addf %7, %5 : vector<8x256xf32>
    %c0_10 = arith.constant 0 : index
    %c0_11 = arith.constant 0 : index
    %9 = vector.load %arg6[%c0_10, %c0_11] : memref<8x256xf32, #tpu.memory_space<vmem>>, vector<8x256xf32>
    tpu.vector_store %arg6[%c0_10, %c0_11], %8 {strides = array<i32>} : memref<8x256xf32, #tpu.memory_space<vmem>>, vector<8x256xf32>,
    return
  }
  func.func @transform_0(%arg0: i32) -> (i32, i32) {
    %c0_i32 = arith.constant 0 : i32
    %c0_i32_0 = arith.constant 0 : i32
    return %arg0, %c0_i32 : i32, i32
  }
  func.func @transform_1(%arg0: i32) -> (i32, i32) {
    %c0_i32 = arith.constant 0 : i32
    %c0_i32_0 = arith.constant 0 : i32
    return %arg0, %c0_i32 : i32, i32
  }
  func.func @transform_2(%arg0: i32) -> (i32, i32) {
    %c0_i32 = arith.constant 0 : i32
    %c0_i32_0 = arith.constant 0 : i32
    return %arg0, %c0_i32 : i32, i32
  }
  func.func @transform_3(%arg0: i32) -> (i32, i32) {
    %c0_i32 = arith.constant 0 : i32
    %c0_i32_0 = arith.constant 0 : i32
    %c0_i32_1 = arith.constant 0 : i32
    return %c0_i32, %c0_i32_0 : i32, i32
  }
  func.func @transform_4(%arg0: i32) -> (i32, i32) {
    %c0_i32 = arith.constant 0 : i32
    %c0_i32_0 = arith.constant 0 : i32
    %c0_i32_1 = arith.constant 0 : i32
    return %c0_i32, %c0_i32_0 : i32, i32
  }
  func.func @transform_5(%arg0: i32) -> (i32, i32) {
    %c0_i32 = arith.constant 0 : i32
    %c0_i32_0 = arith.constant 0 : i32
    return %arg0, %c0_i32 : i32, i32
  }
}

</mosaic_0001>

<bundles_post_ra>
// kernel: tpu_custom_call.1
= control target key start
LH: loop header
LB: loop body
LE: loop exit
PB: predicated region body
PF: predicated region fallthrough
CT: control target
= control target key end

     0   :  { %10 = vsyncpa [#allocation3], 0  ;;  %s579_s0 = inlined_call_operand.hbm [shape: f32[8,256], index: 0, kind: input, shape index: {}]   ;;  %s580_s1 = inlined_call_operand.hbm [shape: f32[8,64], index: 1, kind: input, shape index: {}]   ;;  %s581_s2 = inlined_call_operand.hbm [shape: f32[8,16], index: 2, kind: input, shape index: {}]   ;;  %s582_s3 = inlined_call_operand.hbm [shape: f32[64,256], index: 3, kind: input, shape index: {}]   ;;  %s583_s4 = inlined_call_operand.hbm [shape: f32[16,256], index: 4, kind: input, shape index: {}]   ;;  %s584_s5 = inlined_call_operand.hbm [shape: f32[8,256], index: 5, kind: output, shape index: {}]  }
   0x1   :  { %11 = vsyncpa [#allocation6], 0 }
   0x2   :  { %12 = vsyncpa [#allocation9], 0 }
   0x3   :  { %13 = vsyncpa [#allocation4], 0  ;;  %s455_s18 = smov [#allocation5]   ;;  %s456_s20 = smov [#allocation8]  }
   0x4   :  { %s30_s19 = sshll.u32 %s455_s18, 4  ;;  %s49_s21 = sshll.u32 %s456_s20, 4  ;;  %s31_s19 = int_to_ptr.vmem [resolvable:$true] %s30_s19  ;;  %s494_s21 = int_to_ptr.vmem [resolvable:$true] %s49_s21 }
   0x5   :  { %s315_s24 = scalar_lea.hbm %s580_s1, 128 }
   0x6   :  { %p316_p0 = scmp.ne.s32.totalorder %s580_s1, %s315_s24  ;;  %p319_p1 = scmp.lt.u32.totalorder %s315_s24, %s580_s1 }
   0x8   :  { %p321_p2 = pnand %p319_p1, %p316_p0 }
   0xa   :  { %324 = shalt.err (!%p321_p2)
}
   0xb   :  { %s325_s29 = scalar_lea.vmem %s31_s19, 128  ;;  %p330_p4 = scmp.lt.s32.totalorder %s31_s19, %s31_s19 }
   0xc   :  { %p326_p3 = scmp.ne.s32.totalorder %s31_s19, %s325_s29  ;;  %p331_p5 = scmp.lt.s32.totalorder %s325_s29, %s325_s29 }
   0xe   :  { %p332_p6 = por %p331_p5, %p330_p4 }
  0x10   :  { %p333_p7 = pnand %p332_p6, %p326_p3 }
  0x12   :  { %336 = shalt.err (!%p333_p7)
}
  0x13   :  { %33 = dma.hbm_to_vmem [thread:$0]  %s580_s1, 128, %s31_s19, [#allocation6]  }
  0x14   :  { %s337_s9 = scalar_lea.hbm %s582_s3, 2048 }
  0x15   :  { %p338_p8 = scmp.ne.s32.totalorder %s582_s3, %s337_s9  ;;  %p341_p9 = scmp.lt.u32.totalorder %s337_s9, %s582_s3 }
  0x17   :  { %p343_p10 = pnand %p341_p9, %p338_p8 }
  0x19   :  { %346 = shalt.err (!%p343_p10)
}
  0x1a   :  { %s347_s14 = scalar_lea.vmem %s494_s21, 2048  ;;  %p352_p12 = scmp.lt.s32.totalorder %s494_s21, %s494_s21 }
  0x1b   :  { %p348_p11 = scmp.ne.s32.totalorder %s494_s21, %s347_s14  ;;  %p353_p13 = scmp.lt.s32.totalorder %s347_s14, %s347_s14 }
  0x1d   :  { %p354_p0 = por %p353_p13, %p352_p12 }
  0x1f   :  { %p355_p1 = pnand %p354_p0, %p348_p11 }
  0x21   :  { %358 = shalt.err (!%p355_p1)
}
  0x22   :  { %s457_s1 = smov 256   ;;  %s458_s15 = smov 16  }
  0x23   :  { %55 = dma.hbm_to_vmem [thread:$0]  %s582_s3, 2048, %s494_s21, [#allocation9], %s457_s1, %s457_s1, %s458_s15  }
  0x24   :  { %s459_s18 = smov [#allocation2]   ;;  %s460_s20 = smov [#allocation7]  }
  0x25   :  { %s20_s19 = sshll.u32 %s459_s18, 4  ;;  %s40_s22 = sshll.u32 %s460_s20, 4  ;;  %s21_s19 = int_to_ptr.vmem [resolvable:$true] %s20_s19  ;;  %s41_s22 = int_to_ptr.vmem [resolvable:$true] %s40_s22 }
  0x26   :  { %s359_s25 = scalar_lea.hbm %s579_s0, 256 }
  0x27   :  { %p360_p2 = scmp.ne.s32.totalorder %s579_s0, %s359_s25  ;;  %p363_p3 = scmp.lt.u32.totalorder %s359_s25, %s579_s0 }
  0x29   :  { %p365_p4 = pnand %p363_p3, %p360_p2 }
  0x2b   :  { %368 = shalt.err (!%p365_p4)
}
  0x2c   :  { %s369_s3 = scalar_lea.vmem %s21_s19, 256  ;;  %p374_p6 = scmp.lt.s32.totalorder %s21_s19, %s21_s19 }
  0x2d   :  { %p370_p5 = scmp.ne.s32.totalorder %s21_s19, %s369_s3  ;;  %p375_p7 = scmp.lt.s32.totalorder %s369_s3, %s369_s3 }
  0x2f   :  { %p376_p8 = por %p375_p7, %p374_p6 }
  0x31   :  { %p377_p9 = pnand %p376_p8, %p370_p5 }
  0x33   :  { %380 = shalt.err (!%p377_p9)
}
  0x34   :  { %23 = dma.hbm_to_vmem [thread:$0]  %s579_s0, 256, %s21_s19, [#allocation3]  }
  0x35   :  { %s381_s8 = scalar_lea.hbm %s581_s2, 128 }
  0x36   :  { %p382_p10 = scmp.ne.s32.totalorder %s581_s2, %s381_s8  ;;  %p385_p11 = scmp.lt.u32.totalorder %s381_s8, %s581_s2 }
  0x38   :  { %p387_p12 = pnand %p385_p11, %p382_p10 }
  0x3a   :  { %390 = shalt.err (!%p387_p12)
}
  0x3b   :  { %s391_s13 = scalar_lea.vmem %s41_s22, 128  ;;  %p396_p0 = scmp.lt.s32.totalorder %s41_s22, %s41_s22 }
  0x3c   :  { %p392_p13 = scmp.ne.s32.totalorder %s41_s22, %s391_s13  ;;  %p397_p1 = scmp.lt.s32.totalorder %s391_s13, %s391_s13 }
  0x3e   :  { %p398_p2 = por %p397_p1, %p396_p0 }
  0x40   :  { %p399_p3 = pnand %p398_p2, %p392_p13 }
  0x42   :  { %402 = shalt.err (!%p399_p3)
}
  0x43   :  { %43 = dma.hbm_to_vmem [thread:$0]  %s581_s2, 128, %s41_s22, [#allocation6]  }
  0x44   :  { %s461_s16 = smov [#allocation10]   ;;  %s403_s20 = scalar_lea.hbm %s583_s4, 512 }
  0x45   :  { %s61_s17 = sshll.u32 %s461_s16, 4  ;;  %p404_p4 = scmp.ne.s32.totalorder %s583_s4, %s403_s20  ;;  %s62_s17 = int_to_ptr.vmem [resolvable:$true] %s61_s17 }
  0x46   :  { %p407_p5 = scmp.lt.u32.totalorder %s403_s20, %s583_s4 }
  0x48   :  { %p409_p6 = pnand %p407_p5, %p404_p4 }
  0x4a   :  { %412 = shalt.err (!%p409_p6)
}
  0x4b   :  { %s413_s27 = scalar_lea.vmem %s62_s17, 512  ;;  %p418_p8 = scmp.lt.s32.totalorder %s62_s17, %s62_s17 }
  0x4c   :  { %p414_p7 = scmp.ne.s32.totalorder %s62_s17, %s413_s27  ;;  %p419_p9 = scmp.lt.s32.totalorder %s413_s27, %s413_s27 }
  0x4e   :  { %p420_p10 = por %p419_p9, %p418_p8 }
  0x50   :  { %p421_p11 = pnand %p420_p10, %p414_p7 }
  0x52   :  { %424 = shalt.err (!%p421_p11)
}
  0x53   :  { %67 = dma.hbm_to_vmem [thread:$0]  %s583_s4, 512, %s62_s17, [#allocation9], %s457_s1, %s457_s1, %s458_s15  }
  0x54   :  { %447 = dma.done.wait [#allocation3], 256  }
  0x55   :  { %448 = vsyncadd [#allocation3], 4294967040 }
  0x56   :  { %449 = dma.done.wait [#allocation6], 256  }
  0x57   :  { %450 = vsyncadd [#allocation6], 4294967040 }
  0x58   :  { %451 = dma.done.wait [#allocation9], 2560  }
  0x59   :  { %452 = vsyncadd [#allocation9], 4294964736  ;;  %v462_v0 = vmov 0.0   ;;  %v85_v1 = vld [vmem:[#allocation8 + $0x8] sm:$0xff]  ;;  %v87_v2 = vld [vmem:[#allocation8 + $0x18] sm:$0xff]  ;;  %vm180_vm0 = vcmask 130048  }
  0x5a   :  { %248 = vmatprep.mubr.f32.mxu0 %v462_v0  ;;  %168 = vmatprep.mubr.f32.mxu1 %v462_v0  ;;  %v84_v3 = vld [vmem:[#allocation8] sm:$0xff]  ;;  %v282_v4 = vpack.c.bf16 %v87_v2, %v85_v1  ;;  %v86_v5 = vld [vmem:[#allocation8 + $0x10] sm:$0xff]  ;;  %v89_v6 = vld [vmem:[#allocation8 + $0x28] sm:$0xff]  ;;  %vm100_vm1 = vcmask 523264   ;;  %s463_s4 = smov [#allocation11]  }
  0x5b   :  { %v91_v7 = vld [vmem:[#allocation8 + $0x38] sm:$0xff]  ;;  %v284_v8 = vpack.c.bf16 %v86_v5, %v84_v3  ;;  %v88_v10 = vld [vmem:[#allocation8 + $0x20] sm:$0xff]  ;;  %v90_v11 = vld [vmem:[#allocation8 + $0x30] sm:$0xff]  ;;  %s269_s1 = sshll.u32 %s463_s4, 4  ;;  %s270_s1 = int_to_ptr.vmem [resolvable:$true] %s269_s1 }
  0x5c   :  { %v286_v9 = vpack.c.bf16 %v91_v7, %v89_v6  ;;  %v93_v12 = vld [vmem:[#allocation8 + $0x48] sm:$0xff]  ;;  %283 = vmatprep.subr.bf16.mxu1 %v282_v4  ;;  %v95_v13 = vld [vmem:[#allocation8 + $0x58] sm:$0xff]  ;;  %v288_v14 = vpack.c.bf16 %v90_v11, %v88_v10  ;;  %v92_v15 = vld [vmem:[#allocation8 + $0x40] sm:$0xff]  ;;  %s425_s15 = scalar_lea.vmem %s270_s1, 256  ;;  %p430_p13 = scmp.lt.s32.totalorder %s270_s1, %s270_s1 }
  0x5d   :  { %285 = vmatpush1.bf16.msra.mxu1 %v284_v8  ;;  %v177_v16 = vld [vmem:[#allocation10 + $0x8] sm:$0xff]  ;;  %v179_v17 = vld [vmem:[#allocation10 + $0x18] sm:$0xff]  ;;  %v290_v18 = vpack.c.bf16 %v95_v13, %v93_v12  ;;  %v94_v19 = vld [vmem:[#allocation8 + $0x50] sm:$0xff]  ;;  %p426_p12 = scmp.ne.s32.totalorder %s270_s1, %s425_s15  ;;  %p431_p0 = scmp.lt.s32.totalorder %s425_s15, %s425_s15 }
  0x5e   :  { %287 = vmatprep.subr.bf16.mxu1 %v286_v9  ;;  %v298_v20 = vpack.c.bf16 %v179_v17, %v177_v16  ;;  %v176_v21 = vld [vmem:[#allocation10] sm:$0xff]  ;;  %v178_v22 = vld [vmem:[#allocation10 + $0x10] sm:$0xff]  ;;  %v97_v23 = vld [vmem:[#allocation8 + $0x68] sm:$0xff]  ;;  %v292_v26 = vpack.c.bf16 %v94_v19, %v92_v15 }
  0x5f   :  { %v99_v24 = vld [vmem:[#allocation8 + $0x78] sm:$0xff]  ;;  %v300_v25 = vpack.c.bf16 %v178_v22, %v176_v21  ;;  %v96_v29 = vld [vmem:[#allocation8 + $0x60] sm:$0xff]  ;;  %v98_v30 = vld [vmem:[#allocation8 + $0x70] sm:$0xff]  ;;  %p432_p1 = por %p431_p0, %p430_p13 }
  0x60   :  { %299 = vmatprep.subr.bf16.mxu0 %v298_v20  ;;  %v175_v27 = vld [vmem:[#allocation7] sm:$0xff]  ;;  %v294_v28 = vpack.c.bf16 %v99_v24, %v97_v23  ;;  %v296_v31 = vpack.c.bf16 %v98_v30, %v96_v29  ;;  %v83_v32 = vld [vmem:[#allocation5] sm:$0xff]  ;;  %v255_v36 = vld [vmem:[#allocation2] sm:$0xff] }
  0x61   :  { %289 = vmatpush1.bf16.msra.mxu1 %v288_v14  ;;  %301 = vmatpush1.bf16.msra.mxu0 %v300_v25  ;;  %v256_v39 = vld [vmem:[#allocation2 + $0x8] sm:$0xff]  ;;  %p433_p2 = pnand %p432_p1, %p426_p12 }
  0x62   :  { %291 = vmatprep.subr.bf16.mxu1 %v290_v18 }
  0x64   :  { %281 = vmatmul.mubr.msk.f32.vlgmr.msra.gmra.mrb[0].mxu0 %vm180_vm0, %v175_v27 }
  0x65   :  { %293 = vmatpush1.bf16.msra.mxu1 %v292_v26 }
  0x66   :  { %295 = vmatprep.subr.bf16.mxu1 %v294_v28 }
  0x69   :  { %297 = vmatpush1.bf16.msra.mxu1 %v296_v31 }
  0x6c   :  { %280 = vmatmul.mubr.msk.f32.vlgmr.msra.gmra.mrb[0].mxu1 %vm100_vm1, %v83_v32 }
 0x137   :  { %v250_v33 = vpop.f32.mrb[0].mxu0 }
 0x138   :  { %v252_v34 = vpop.f32.mrb[1].mxu0 }
 0x13f   :  { %v170_v35 = vpop.f32.mrb[0].mxu1 }
 0x140   :  { %v302_v37 = vadd.f32 %v250_v33, %v170_v35  ;;  %v172_v38 = vpop.f32.mrb[1].mxu1 }
 0x141   :  { %v304_v40 = vadd.f32 %v252_v34, %v172_v38 }
 0x142   :  { %v303_v41 = vadd.f32 %v302_v37, %v255_v36 }
 0x143   :  { %v305_v42 = vadd.f32 %v304_v40, %v256_v39 }
 0x144   :  { %261 = vst [vmem:[#allocation11] sm:$0xff] %v303_v41 }
 0x145   :  { %262 = vst [vmem:[#allocation11 + $0x8] sm:$0xff] %v305_v42 }
 0x146   :  { %436 = shalt.err (!%p433_p2)
}
 0x147   :  { %s437_s3 = scalar_lea.hbm %s584_s5, 256 }
 0x148   :  { %p438_p3 = scmp.ne.s32.totalorder %s584_s5, %s437_s3  ;;  %p441_p4 = scmp.lt.u32.totalorder %s437_s3, %s584_s5 }
 0x14a   :  { %p443_p5 = pnand %p441_p4, %p438_p3 }
 0x14c   :  { %446 = shalt.err (!%p443_p5)
}
 0x14d   :  { %272 = dma.vmem_to_hbm [thread:$0]  %s270_s1, 256, %s584_s5, [#allocation4]  }
 0x14e   :  { %453 = dma.done.wait [#allocation4], 256  }
 0x14f   :  { %454 = vsyncadd [#allocation4], 4294967040 }
 0x150   :  { %276 = vsyncpa [#allocation3], 1 }
 0x151   :  { %277 = vsyncpa [#allocation6], 1 }
 0x152   :  { %278 = vsyncpa [#allocation9], 1 }
 0x153   :  { %279 = vsyncpa [#allocation4], 1 }

// kernel: tpu_custom_call.1
= control target key start
LH: loop header
LB: loop body
LE: loop exit
PB: predicated region body
PF: predicated region fallthrough
CT: control target
= control target key end

     0   :  { %10 = vsyncpa [#allocation3], 0  ;;  %s579_s0 = inlined_call_operand.hbm [shape: f32[8,256], index: 0, kind: input, shape index: {}]   ;;  %s580_s1 = inlined_call_operand.hbm [shape: f32[8,64], index: 1, kind: input, shape index: {}]   ;;  %s581_s2 = inlined_call_operand.hbm [shape: f32[8,16], index: 2, kind: input, shape index: {}]   ;;  %s582_s3 = inlined_call_operand.hbm [shape: f32[64,256], index: 3, kind: input, shape index: {}]   ;;  %s583_s4 = inlined_call_operand.hbm [shape: f32[16,256], index: 4, kind: input, shape index: {}]   ;;  %s584_s5 = inlined_call_operand.hbm [shape: f32[8,256], index: 5, kind: output, shape index: {}]  }
   0x1   :  { %11 = vsyncpa [#allocation6], 0 }
   0x2   :  { %12 = vsyncpa [#allocation9], 0 }
   0x3   :  { %13 = vsyncpa [#allocation4], 0  ;;  %s455_s18 = smov [#allocation5]   ;;  %s456_s20 = smov [#allocation8]  }
   0x4   :  { %s30_s19 = sshll.u32 %s455_s18, 4  ;;  %s49_s21 = sshll.u32 %s456_s20, 4  ;;  %s31_s19 = int_to_ptr.vmem [resolvable:$true] %s30_s19  ;;  %s494_s21 = int_to_ptr.vmem [resolvable:$true] %s49_s21 }
   0x5   :  { %s315_s24 = scalar_lea.hbm %s580_s1, 128 }
   0x6   :  { %p316_p0 = scmp.ne.s32.totalorder %s580_s1, %s315_s24  ;;  %p319_p1 = scmp.lt.u32.totalorder %s315_s24, %s580_s1 }
   0x8   :  { %p321_p2 = pnand %p319_p1, %p316_p0 }
   0xa   :  { %324 = shalt.err (!%p321_p2)
}
   0xb   :  { %s325_s29 = scalar_lea.vmem %s31_s19, 128  ;;  %p330_p4 = scmp.lt.s32.totalorder %s31_s19, %s31_s19 }
   0xc   :  { %p326_p3 = scmp.ne.s32.totalorder %s31_s19, %s325_s29  ;;  %p331_p5 = scmp.lt.s32.totalorder %s325_s29, %s325_s29 }
   0xe   :  { %p332_p6 = por %p331_p5, %p330_p4 }
  0x10   :  { %p333_p7 = pnand %p332_p6, %p326_p3 }
  0x12   :  { %336 = shalt.err (!%p333_p7)
}
  0x13   :  { %33 = dma.hbm_to_vmem [thread:$0]  %s580_s1, 128, %s31_s19, [#allocation6]  }
  0x14   :  { %s337_s9 = scalar_lea.hbm %s582_s3, 2048 }
  0x15   :  { %p338_p8 = scmp.ne.s32.totalorder %s582_s3, %s337_s9  ;;  %p341_p9 = scmp.lt.u32.totalorder %s337_s9, %s582_s3 }
  0x17   :  { %p343_p10 = pnand %p341_p9, %p338_p8 }
  0x19   :  { %346 = shalt.err (!%p343_p10)
}
  0x1a   :  { %s347_s14 = scalar_lea.vmem %s494_s21, 2048  ;;  %p352_p12 = scmp.lt.s32.totalorder %s494_s21, %s494_s21 }
  0x1b   :  { %p348_p11 = scmp.ne.s32.totalorder %s494_s21, %s347_s14  ;;  %p353_p13 = scmp.lt.s32.totalorder %s347_s14, %s347_s14 }
  0x1d   :  { %p354_p0 = por %p353_p13, %p352_p12 }
  0x1f   :  { %p355_p1 = pnand %p354_p0, %p348_p11 }
  0x21   :  { %358 = shalt.err (!%p355_p1)
}
  0x22   :  { %s457_s1 = smov 256   ;;  %s458_s15 = smov 16  }
  0x23   :  { %55 = dma.hbm_to_vmem [thread:$0]  %s582_s3, 2048, %s494_s21, [#allocation9], %s457_s1, %s457_s1, %s458_s15  }
  0x24   :  { %s459_s18 = smov [#allocation2]   ;;  %s460_s20 = smov [#allocation7]  }
  0x25   :  { %s20_s19 = sshll.u32 %s459_s18, 4  ;;  %s40_s22 = sshll.u32 %s460_s20, 4  ;;  %s21_s19 = int_to_ptr.vmem [resolvable:$true] %s20_s19  ;;  %s41_s22 = int_to_ptr.vmem [resolvable:$true] %s40_s22 }
  0x26   :  { %s359_s25 = scalar_lea.hbm %s579_s0, 256 }
  0x27   :  { %p360_p2 = scmp.ne.s32.totalorder %s579_s0, %s359_s25  ;;  %p363_p3 = scmp.lt.u32.totalorder %s359_s25, %s579_s0 }
  0x29   :  { %p365_p4 = pnand %p363_p3, %p360_p2 }
  0x2b   :  { %368 = shalt.err (!%p365_p4)
}
  0x2c   :  { %s369_s3 = scalar_lea.vmem %s21_s19, 256  ;;  %p374_p6 = scmp.lt.s32.totalorder %s21_s19, %s21_s19 }
  0x2d   :  { %p370_p5 = scmp.ne.s32.totalorder %s21_s19, %s369_s3  ;;  %p375_p7 = scmp.lt.s32.totalorder %s369_s3, %s369_s3 }
  0x2f   :  { %p376_p8 = por %p375_p7, %p374_p6 }
  0x31   :  { %p377_p9 = pnand %p376_p8, %p370_p5 }
  0x33   :  { %380 = shalt.err (!%p377_p9)
}
  0x34   :  { %23 = dma.hbm_to_vmem [thread:$0]  %s579_s0, 256, %s21_s19, [#allocation3]  }
  0x35   :  { %s381_s8 = scalar_lea.hbm %s581_s2, 128 }
  0x36   :  { %p382_p10 = scmp.ne.s32.totalorder %s581_s2, %s381_s8  ;;  %p385_p11 = scmp.lt.u32.totalorder %s381_s8, %s581_s2 }
  0x38   :  { %p387_p12 = pnand %p385_p11, %p382_p10 }
  0x3a   :  { %390 = shalt.err (!%p387_p12)
}
  0x3b   :  { %s391_s13 = scalar_lea.vmem %s41_s22, 128  ;;  %p396_p0 = scmp.lt.s32.totalorder %s41_s22, %s41_s22 }
  0x3c   :  { %p392_p13 = scmp.ne.s32.totalorder %s41_s22, %s391_s13  ;;  %p397_p1 = scmp.lt.s32.totalorder %s391_s13, %s391_s13 }
  0x3e   :  { %p398_p2 = por %p397_p1, %p396_p0 }
  0x40   :  { %p399_p3 = pnand %p398_p2, %p392_p13 }
  0x42   :  { %402 = shalt.err (!%p399_p3)
}
  0x43   :  { %43 = dma.hbm_to_vmem [thread:$0]  %s581_s2, 128, %s41_s22, [#allocation6]  }
  0x44   :  { %s461_s16 = smov [#allocation10]   ;;  %s403_s20 = scalar_lea.hbm %s583_s4, 512 }
  0x45   :  { %s61_s17 = sshll.u32 %s461_s16, 4  ;;  %p404_p4 = scmp.ne.s32.totalorder %s583_s4, %s403_s20  ;;  %s62_s17 = int_to_ptr.vmem [resolvable:$true] %s61_s17 }
  0x46   :  { %p407_p5 = scmp.lt.u32.totalorder %s403_s20, %s583_s4 }
  0x48   :  { %p409_p6 = pnand %p407_p5, %p404_p4 }
  0x4a   :  { %412 = shalt.err (!%p409_p6)
}
  0x4b   :  { %s413_s27 = scalar_lea.vmem %s62_s17, 512  ;;  %p418_p8 = scmp.lt.s32.totalorder %s62_s17, %s62_s17 }
  0x4c   :  { %p414_p7 = scmp.ne.s32.totalorder %s62_s17, %s413_s27  ;;  %p419_p9 = scmp.lt.s32.totalorder %s413_s27, %s413_s27 }
  0x4e   :  { %p420_p10 = por %p419_p9, %p418_p8 }
  0x50   :  { %p421_p11 = pnand %p420_p10, %p414_p7 }
  0x52   :  { %424 = shalt.err (!%p421_p11)
}
  0x53   :  { %67 = dma.hbm_to_vmem [thread:$0]  %s583_s4, 512, %s62_s17, [#allocation9], %s457_s1, %s457_s1, %s458_s15  }
  0x54   :  { %447 = dma.done.wait [#allocation3], 256  }
  0x55   :  { %448 = vsyncadd [#allocation3], 4294967040 }
  0x56   :  { %449 = dma.done.wait [#allocation6], 256  }
  0x57   :  { %450 = vsyncadd [#allocation6], 4294967040 }
  0x58   :  { %451 = dma.done.wait [#allocation9], 2560  }
  0x59   :  { %452 = vsyncadd [#allocation9], 4294964736  ;;  %v462_v0 = vmov 0.0   ;;  %v85_v1 = vld [vmem:[#allocation8 + $0x8] sm:$0xff]  ;;  %v87_v2 = vld [vmem:[#allocation8 + $0x18] sm:$0xff]  ;;  %vm180_vm0 = vcmask 130048  }
  0x5a   :  { %248 = vmatprep.mubr.f32.mxu0 %v462_v0  ;;  %168 = vmatprep.mubr.f32.mxu1 %v462_v0  ;;  %v84_v3 = vld [vmem:[#allocation8] sm:$0xff]  ;;  %v282_v4 = vpack.c.bf16 %v87_v2, %v85_v1  ;;  %v86_v5 = vld [vmem:[#allocation8 + $0x10] sm:$0xff]  ;;  %v89_v6 = vld [vmem:[#allocation8 + $0x28] sm:$0xff]  ;;  %vm100_vm1 = vcmask 523264   ;;  %s463_s4 = smov [#allocation11]  }
  0x5b   :  { %v91_v7 = vld [vmem:[#allocation8 + $0x38] sm:$0xff]  ;;  %v284_v8 = vpack.c.bf16 %v86_v5, %v84_v3  ;;  %v88_v10 = vld [vmem:[#allocation8 + $0x20] sm:$0xff]  ;;  %v90_v11 = vld [vmem:[#allocation8 + $0x30] sm:$0xff]  ;;  %s269_s1 = sshll.u32 %s463_s4, 4  ;;  %s270_s1 = int_to_ptr.vmem [resolvable:$true] %s269_s1 }
  0x5c   :  { %v286_v9 = vpack.c.bf16 %v91_v7, %v89_v6  ;;  %v93_v12 = vld [vmem:[#allocation8 + $0x48] sm:$0xff]  ;;  %283 = vmatprep.subr.bf16.mxu1 %v282_v4  ;;  %v95_v13 = vld [vmem:[#allocation8 + $0x58] sm:$0xff]  ;;  %v288_v14 = vpack.c.bf16 %v90_v11, %v88_v10  ;;  %v92_v15 = vld [vmem:[#allocation8 + $0x40] sm:$0xff]  ;;  %s425_s15 = scalar_lea.vmem %s270_s1, 256  ;;  %p430_p13 = scmp.lt.s32.totalorder %s270_s1, %s270_s1 }
  0x5d   :  { %285 = vmatpush1.bf16.msra.mxu1 %v284_v8  ;;  %v177_v16 = vld [vmem:[#allocation10 + $0x8] sm:$0xff]  ;;  %v179_v17 = vld [vmem:[#allocation10 + $0x18] sm:$0xff]  ;;  %v290_v18 = vpack.c.bf16 %v95_v13, %v93_v12  ;;  %v94_v19 = vld [vmem:[#allocation8 + $0x50] sm:$0xff]  ;;  %p426_p12 = scmp.ne.s32.totalorder %s270_s1, %s425_s15  ;;  %p431_p0 = scmp.lt.s32.totalorder %s425_s15, %s425_s15 }
  0x5e   :  { %287 = vmatprep.subr.bf16.mxu1 %v286_v9  ;;  %v298_v20 = vpack.c.bf16 %v179_v17, %v177_v16  ;;  %v176_v21 = vld [vmem:[#allocation10] sm:$0xff]  ;;  %v178_v22 = vld [vmem:[#allocation10 + $0x10] sm:$0xff]  ;;  %v97_v23 = vld [vmem:[#allocation8 + $0x68] sm:$0xff]  ;;  %v292_v26 = vpack.c.bf16 %v94_v19, %v92_v15 }
  0x5f   :  { %v99_v24 = vld [vmem:[#allocation8 + $0x78] sm:$0xff]  ;;  %v300_v25 = vpack.c.bf16 %v178_v22, %v176_v21  ;;  %v96_v29 = vld [vmem:[#allocation8 + $0x60] sm:$0xff]  ;;  %v98_v30 = vld [vmem:[#allocation8 + $0x70] sm:$0xff]  ;;  %p432_p1 = por %p431_p0, %p430_p13 }
  0x60   :  { %299 = vmatprep.subr.bf16.mxu0 %v298_v20  ;;  %v175_v27 = vld [vmem:[#allocation7] sm:$0xff]  ;;  %v294_v28 = vpack.c.bf16 %v99_v24, %v97_v23  ;;  %v296_v31 = vpack.c.bf16 %v98_v30, %v96_v29  ;;  %v83_v32 = vld [vmem:[#allocation5] sm:$0xff]  ;;  %v255_v36 = vld [vmem:[#allocation2] sm:$0xff] }
  0x61   :  { %289 = vmatpush1.bf16.msra.mxu1 %v288_v14  ;;  %301 = vmatpush1.bf16.msra.mxu0 %v300_v25  ;;  %v256_v39 = vld [vmem:[#allocation2 + $0x8] sm:$0xff]  ;;  %p433_p2 = pnand %p432_p1, %p426_p12 }
  0x62   :  { %291 = vmatprep.subr.bf16.mxu1 %v290_v18 }
  0x64   :  { %281 = vmatmul.mubr.msk.f32.vlgmr.msra.gmra.mrb[0].mxu0 %vm180_vm0, %v175_v27 }
  0x65   :  { %293 = vmatpush1.bf16.msra.mxu1 %v292_v26 }
  0x66   :  { %295 = vmatprep.subr.bf16.mxu1 %v294_v28 }
  0x69   :  { %297 = vmatpush1.bf16.msra.mxu1 %v296_v31 }
  0x6c   :  { %280 = vmatmul.mubr.msk.f32.vlgmr.msra.gmra.mrb[0].mxu1 %vm100_vm1, %v83_v32 }
 0x137   :  { %v250_v33 = vpop.f32.mrb[0].mxu0 }
 0x138   :  { %v252_v34 = vpop.f32.mrb[1].mxu0 }
 0x13f   :  { %v170_v35 = vpop.f32.mrb[0].mxu1 }
 0x140   :  { %v302_v37 = vadd.f32 %v250_v33, %v170_v35  ;;  %v172_v38 = vpop.f32.mrb[1].mxu1 }
 0x141   :  { %v304_v40 = vadd.f32 %v252_v34, %v172_v38 }
 0x142   :  { %v303_v41 = vadd.f32 %v302_v37, %v255_v36 }
 0x143   :  { %v305_v42 = vadd.f32 %v304_v40, %v256_v39 }
 0x144   :  { %261 = vst [vmem:[#allocation11] sm:$0xff] %v303_v41 }
 0x145   :  { %262 = vst [vmem:[#allocation11 + $0x8] sm:$0xff] %v305_v42 }
 0x146   :  { %436 = shalt.err (!%p433_p2)
}
 0x147   :  { %s437_s3 = scalar_lea.hbm %s584_s5, 256 }
 0x148   :  { %p438_p3 = scmp.ne.s32.totalorder %s584_s5, %s437_s3  ;;  %p441_p4 = scmp.lt.u32.totalorder %s437_s3, %s584_s5 }
 0x14a   :  { %p443_p5 = pnand %p441_p4, %p438_p3 }
 0x14c   :  { %446 = shalt.err (!%p443_p5)
}
 0x14d   :  { %272 = dma.vmem_to_hbm [thread:$0]  %s270_s1, 256, %s584_s5, [#allocation4]  }
 0x14e   :  { %453 = dma.done.wait [#allocation4], 256  }
 0x14f   :  { %454 = vsyncadd [#allocation4], 4294967040 }
 0x150   :  { %276 = vsyncpa [#allocation3], 1 }
 0x151   :  { %277 = vsyncpa [#allocation6], 1 }
 0x152   :  { %278 = vsyncpa [#allocation9], 1 }
 0x153   :  { %279 = vsyncpa [#allocation4], 1 }

</bundles_post_ra>
